<compile_context>
chip_gen: v6e
topology: v6e:2x2x1
jax: 0.10.0
libtpu: 0.0.40
codegen_flags: <defaults>
</compile_context>

<pallas_src>
import functools

import jax
import jax.numpy as jnp
from jax.experimental import pallas as pl
from jax.experimental.pallas import tpu as pltpu

LANES = 128           # vreg lane width (fast axis)
SUBLANES = 8          # f32 sublanes per vreg
ROW_ALIGN = 16        # row alignment satisfying both f32 (8) and bf16 (16) tiling
CHUNK_ROWS = 256      # rows per inner accumulation pass (keeps live temporaries small)
MAX_TILE_ROWS = 4096  # (4096,128) f32 = 2 MiB/block; 2 inputs x 2 buffers = 8 MiB VMEM


def _round_up(x, m):
    return -(-x // m) * m


def _weighted_bce(x, y, pos_weight, neg_weight):
    """Elementwise weighted BCE-with-logits in f32 (shared by kernel + jnp tail)."""
    x = x.astype(jnp.float32)
    y = y.astype(jnp.float32)
    # Numerically stable BCEWithLogitsLoss(reduction='none'):
    #   max(x, 0) - x*y + log(1 + exp(-|x|))
    bce = jnp.maximum(x, 0.0) - x * y + jnp.log1p(jnp.exp(-jnp.abs(x)))
    # Matches the PyTorch module exactly: weighted = bce * (pos_w + neg_w),
    # pos_w = pos_weight iff y==1 else 1, neg_w = neg_weight iff y==0 else 1.
    pos_w = jnp.where(y == 1.0, jnp.float32(pos_weight), jnp.float32(1.0))
    neg_w = jnp.where(y == 0.0, jnp.float32(neg_weight), jnp.float32(1.0))
    return bce * (pos_w + neg_w)


def _wbce_kernel(x_ref, y_ref, out_ref, *, pos_weight, neg_weight,
                 tile_rows, chunk_rows, steps_per_core, last_step,
                 valid_rows_last, mask_needed):
    p = pl.program_id(0)   # "parallel" axis (TensorCore split on multi-TC chips)
    s = pl.program_id(1)   # "arbitrary" reduction axis

    @pl.when(s == 0)
    def _():
        out_ref[...] = jnp.zeros_like(out_ref)

    nchunks = tile_rows // chunk_rows

    def tile_partial_sum(valid_rows):
        # valid_rows: None => every row of this tile is valid (hot path, no mask);
        #             int  => only the first `valid_rows` rows are valid (last tile).
        def compute(xc, yc, r0):
            w = _weighted_bce(xc, yc, pos_weight, neg_weight)
            if valid_rows is not None:
                row = r0 + jax.lax.broadcasted_iota(jnp.int32, w.shape, 0)
                w = jnp.where(row < valid_rows, w, 0.0)
            # Fold (chunk_rows,128) onto one (8,128) block: reshape stays on
            # (8,128) tile boundaries -> pure VPU adds (no XLU, no scalar store).
            return w.reshape(w.shape[0] // SUBLANES, SUBLANES, LANES).sum(axis=0)

        if nchunks == 1:
            return compute(x_ref[...], y_ref[...], 0)

        def body(k, acc):
            r0 = pl.multiple_of(k * chunk_rows, chunk_rows)
            return acc + compute(x_ref[pl.ds(r0, chunk_rows), :],
                                 y_ref[pl.ds(r0, chunk_rows), :], r0)

        return jax.lax.fori_loop(0, nchunks, body,
                                 jnp.zeros((SUBLANES, LANES), jnp.float32))

    if mask_needed:
        # Only the final tile can contain out-of-range rows; keep the row mask
        # (iota + compare + select) entirely off the hot path.
        is_last = (p * steps_per_core + s) == last_step

        @pl.when(jnp.logical_not(is_last))
        def _():
            out_ref[...] += tile_partial_sum(None)

        @pl.when(is_last)
        def _():
            out_ref[...] += tile_partial_sum(valid_rows_last)
    else:
        out_ref[...] += tile_partial_sum(None)


@functools.partial(jax.jit,
                   static_argnames=("pos_weight", "neg_weight", "max_tile_rows"))
def weighted_bce_loss(outputs, targets, pos_weight=1.0, neg_weight=1.0,
                      max_tile_rows=MAX_TILE_ROWS):
    """Mean of weighted BCE-with-logits over all elements (any shape / dtype)."""
    assert outputs.shape == targets.shape
    n = outputs.size
    x = outputs.reshape(-1)   # free (contiguous) flatten; native dtype streamed
    y = targets.reshape(-1)

    rows = n // LANES          # complete 128-lane rows handled by the kernel
    rem = n - rows * LANES     # sub-row tail (< 128 elems) handled by plain jnp

    pw = float(pos_weight)
    nw = float(neg_weight)

    total = jnp.float32(0.0)

    if rows > 0:
        n_bulk = rows * LANES
        if rem == 0:
            xb, yb = x, y      # zero-copy: reshape below is a layout bitcast
        else:
            # TODO(synk): this prefix slice materializes a copy of the bulk; a
            # truly zero-copy ragged path would need the kernel to consume the
            # raw 1-D buffer via manual DMA. Only non-multiple-of-128 sizes pay it.
            xb, yb = x[:n_bulk], y[:n_bulk]
        x2 = xb.reshape(rows, LANES)
        y2 = yb.reshape(rows, LANES)

        # Tile / grid selection.
        if rows >= max_tile_rows:
            tile_rows = max_tile_rows
        else:
            tile_rows = _round_up(rows, ROW_ALIGN)
        chunk_rows = min(CHUNK_ROWS, tile_rows)
        assert tile_rows % chunk_rows == 0

        num_blocks = -(-rows // tile_rows)       # grid over-covers rows (cdiv)
        mask_needed = (rows % tile_rows) != 0
        valid_rows_last = rows - (num_blocks - 1) * tile_rows

        # Shard the grid across TensorCores when there is enough work and the
        # block count splits evenly (harmless sequential 2-D grid on 1-TC chips;
        # never adds a pad tile).
        num_cores = 2 if (num_blocks >= 8 and num_blocks % 2 == 0) else 1
        steps_per_core = num_blocks // num_cores

        kernel = functools.partial(
            _wbce_kernel,
            pos_weight=pw, neg_weight=nw,
            tile_rows=tile_rows, chunk_rows=chunk_rows,
            steps_per_core=steps_per_core, last_step=num_blocks - 1,
            valid_rows_last=valid_rows_last, mask_needed=mask_needed,
        )

        in_spec = pl.BlockSpec((tile_rows, LANES),
                               lambda p, s: (p * steps_per_core + s, 0))
        out_spec = pl.BlockSpec((SUBLANES, LANES), lambda p, s: (p, 0))

        partials = pl.pallas_call(
            kernel,
            out_shape=jax.ShapeDtypeStruct((num_cores * SUBLANES, LANES),
                                           jnp.float32),
            grid_spec=pltpu.PrefetchScalarGridSpec(
                num_scalar_prefetch=0,
                grid=(num_cores, steps_per_core),
                in_specs=[in_spec, in_spec],
                out_specs=out_spec,
            ),
            compiler_params=pltpu.CompilerParams(
                # TODO(synk): on v7x, verify the leading axis really shards
                # across both TensorCores; if the trace shows a serial split,
                # switch to (pltpu.CORE_PARALLEL, pltpu.ARBITRARY).
                dimension_semantics=("parallel", "arbitrary"),
                vmem_limit_bytes=32 * 1024 * 1024,
            ),
        )(x2, y2)
        total = total + jnp.sum(partials)

    if rem > 0:
        # Sub-row tail: tiny (< 128 elems) fused jnp slab — no extra HBM pass.
        total = total + jnp.sum(
            _weighted_bce(x[rows * LANES:], y[rows * LANES:], pw, nw))

    return (total / jnp.float32(n)).astype(jnp.float32)


def _reference(outputs, targets, pos_weight=1.0, neg_weight=1.0):
    x = outputs.astype(jnp.float32)
    y = targets.astype(jnp.float32)
    bce = jnp.maximum(x, 0.0) - x * y + jnp.log1p(jnp.exp(-jnp.abs(x)))
    pos_w = jnp.where(y == 1.0, pos_weight, 1.0)
    neg_w = jnp.where(y == 0.0, neg_weight, 1.0)
    return jnp.mean(bce * (pos_w + neg_w))


if __name__ == "__main__":
    key = jax.random.PRNGKey(0)
    k1, k2, k3, k4, k5, k6 = jax.random.split(key, 6)

    pos_weight, neg_weight = 2.0, 0.5  # deterministic module "parameters"

    # Case 1: NCHW f32 logits + binary targets, n % 128 == 0 -> fully zero-copy
    # single-tile path (no mask, no tail).
    shape1 = (2, 4, 16, 16)
    out1 = jax.random.normal(k1, shape1, dtype=jnp.float32)
    tgt1 = (jax.random.uniform(k2, shape1) > 0.5).astype(jnp.float32)
    loss1 = jax.block_until_ready(
        weighted_bce_loss(out1, tgt1, pos_weight=pos_weight, neg_weight=neg_weight))
    ref1 = _reference(out1, tgt1, pos_weight, neg_weight)
    assert jnp.allclose(loss1, ref1, rtol=1e-4, atol=1e-6), (loss1, ref1)

    # Case 2: bf16 inputs (streamed natively, cast in-kernel) with n % 128 != 0:
    # exercises the partial-last-tile row mask and the jnp sub-row tail.
    shape2 = (2, 3, 17, 16)
    out2 = jax.random.normal(k3, shape2, dtype=jnp.float32).astype(jnp.bfloat16)
    tgt2 = (jax.random.uniform(k4, shape2) > 0.5).astype(jnp.bfloat16)
    loss2 = jax.block_until_ready(
        weighted_bce_loss(out2, tgt2, pos_weight=pos_weight, neg_weight=neg_weight))
    ref2 = _reference(out2, tgt2, pos_weight, neg_weight)
    assert jnp.allclose(loss2, ref2, rtol=1e-4, atol=1e-6), (loss2, ref2)

    # Case 3: still small (~1.9 MB), but with max_tile_rows shrunk so the
    # multi-tile grid, the 2-core "parallel" split, the chunked inner
    # accumulation loop, the partial-last-tile mask and the sub-row tail are
    # all exercised (8 blocks of 512 rows, 216 valid rows in the last one).
    shape3 = (700, 695)
    out3 = jax.random.normal(k5, shape3, dtype=jnp.float32)
    tgt3 = (jax.random.uniform(k6, shape3) > 0.5).astype(jnp.float32)
    loss3 = jax.block_until_ready(
        weighted_bce_loss(out3, tgt3, pos_weight=pos_weight, neg_weight=neg_weight,
                          max_tile_rows=512))
    ref3 = _reference(out3, tgt3, pos_weight, neg_weight)
    assert jnp.allclose(loss3, ref3, rtol=1e-4, atol=1e-6), (loss3, ref3)

    print("KERNEL_OK")
</pallas_src>

<mosaic_0001>
module attributes {stable_mosaic.version = 11 : i64} {
  func.func @_wbce_kernel(%arg0: i32, %arg1: i32, %arg2: memref<16x128xf32, #tpu.memory_space<vmem>>, %arg3: memref<16x128xf32, #tpu.memory_space<vmem>>, %arg4: memref<8x128xf32, #tpu.memory_space<vmem>>) attributes {dimension_semantics = [#tpu.dimension_semantics<parallel>, #tpu.dimension_semantics<arbitrary>], iteration_bounds = array<i64: 1, 1>, scalar_prefetch = 0 : i64, scratch_operands = 0 : i64, tpu.core_type = #tpu.core_type<tc>, window_params = [{transform_indices = @transform_0, window_bounds = array<i64: 16, 128>}, {transform_indices = @transform_1, window_bounds = array<i64: 16, 128>}, {transform_indices = @transform_2, window_bounds = array<i64: 8, 128>}]} {
    %c0_i32 = arith.constant 0 : i32
    %0 = arith.cmpi eq, %arg1, %c0_i32 : i32
    %1 = arith.extui %0 : i1 to i32
    %c0_i32_0 = arith.constant 0 : i32
    %2 = arith.cmpi ne, %1, %c0_i32_0 : i32
    scf.if %2 {
      %cst_16 = arith.constant 0.000000e+00 : f32
      %32 = vector.broadcast %cst_16 : f32 to vector<8x128xf32>
      %c0_17 = arith.constant 0 : index
      %c0_18 = arith.constant 0 : index
      %33 = vector.load %arg4[%c0_17, %c0_18] : memref<8x128xf32, #tpu.memory_space<vmem>>, vector<8x128xf32>
      tpu.vector_store %arg4[%c0_17, %c0_18], %32 {strides = array<i32>} : memref<8x128xf32, #tpu.memory_space<vmem>>, vector<8x128xf32>,
    } else {
    }
    %c0 = arith.constant 0 : index
    %c0_1 = arith.constant 0 : index
    %3 = vector.load %arg4[%c0, %c0_1] : memref<8x128xf32, #tpu.memory_space<vmem>>, vector<8x128xf32>
    %c0_2 = arith.constant 0 : index
    %c0_3 = arith.constant 0 : index
    %4 = vector.load %arg2[%c0_2, %c0_3] : memref<16x128xf32, #tpu.memory_space<vmem>>, vector<16x128xf32>
    %c0_4 = arith.constant 0 : index
    %c0_5 = arith.constant 0 : index
    %5 = vector.load %arg3[%c0_4, %c0_5] : memref<16x128xf32, #tpu.memory_space<vmem>>, vector<16x128xf32>
    %cst = arith.constant 0.000000e+00 : f32
    %6 = vector.broadcast %cst : f32 to vector<16x128xf32>
    %7 = arith.maximumf %4, %6 : vector<16x128xf32>
    %8 = arith.mulf %4, %5 : vector<16x128xf32>
    %9 = arith.subf %7, %8 : vector<16x128xf32>
    %10 = math.absf %4 : vector<16x128xf32>
    %cst_6 = arith.constant 0.000000e+00 : f32
    %11 = vector.broadcast %cst_6 : f32 to vector<16x128xf32>
    %12 = arith.subf %11, %10 : vector<16x128xf32>
    %13 = math.exp %12 : vector<16x128xf32>
    %14 = math.log1p %13 : vector<16x128xf32>
    %15 = arith.addf %9, %14 : vector<16x128xf32>
    %cst_7 = arith.constant 1.000000e+00 : f32
    %16 = vector.broadcast %cst_7 : f32 to vector<16x128xf32>
    %17 = arith.cmpf oeq, %5, %16 : vector<16x128xf32>
    %cst_8 = arith.constant 2.000000e+00 : f32
    %cst_9 = arith.constant 1.000000e+00 : f32
    %18 = vector.broadcast %cst_8 : f32 to vector<16x128xf32>
    %19 = vector.broadcast %cst_9 : f32 to vector<16x128xf32>
    %20 = arith.select %17, %18, %19 : vector<16x128xi1>, vector<16x128xf32>
    %cst_10 = arith.constant 0.000000e+00 : f32
    %21 = vector.broadcast %cst_10 : f32 to vector<16x128xf32>
    %22 = arith.cmpf oeq, %5, %21 : vector<16x128xf32>
    %cst_11 = arith.constant 5.000000e-01 : f32
    %cst_12 = arith.constant 1.000000e+00 : f32
    %23 = vector.broadcast %cst_11 : f32 to vector<16x128xf32>
    %24 = vector.broadcast %cst_12 : f32 to vector<16x128xf32>
    %25 = arith.select %22, %23, %24 : vector<16x128xi1>, vector<16x128xf32>
    %26 = arith.addf %20, %25 : vector<16x128xf32>
    %27 = arith.mulf %15, %26 : vector<16x128xf32>
    %28 = vector.shape_cast %27 : vector<16x128xf32> to vector<2x8x128xf32>
    %cst_13 = arith.constant dense<0.000000e+00> : vector<8x128xf32>
    %29 = vector.multi_reduction <add>, %28, %cst_13 [0] : vector<2x8x128xf32> to vector<8x128xf32>
    %30 = arith.addf %3, %29 : vector<8x128xf32>
    %c0_14 = arith.constant 0 : index
    %c0_15 = arith.constant 0 : index
    %31 = vector.load %arg4[%c0_14, %c0_15] : memref<8x128xf32, #tpu.memory_space<vmem>>, vector<8x128xf32>
    tpu.vector_store %arg4[%c0_14, %c0_15], %30 {strides = array<i32>} : memref<8x128xf32, #tpu.memory_space<vmem>>, vector<8x128xf32>,
    return
  }
  func.func @transform_0(%arg0: i32, %arg1: i32) -> (i32, i32) {
    %c1_i32 = arith.constant 1 : i32
    %0 = arith.muli %arg0, %c1_i32 : i32
    %1 = arith.addi %0, %arg1 : i32
    %c0_i32 = arith.constant 0 : i32
    %c0_i32_0 = arith.constant 0 : i32
    return %1, %c0_i32 : i32, i32
  }
  func.func @transform_1(%arg0: i32, %arg1: i32) -> (i32, i32) {
    %c1_i32 = arith.constant 1 : i32
    %0 = arith.muli %arg0, %c1_i32 : i32
    %1 = arith.addi %0, %arg1 : i32
    %c0_i32 = arith.constant 0 : i32
    %c0_i32_0 = arith.constant 0 : i32
    return %1, %c0_i32 : i32, i32
  }
  func.func @transform_2(%arg0: i32, %arg1: i32) -> (i32, i32) {
    %c0_i32 = arith.constant 0 : i32
    %c0_i32_0 = arith.constant 0 : i32
    return %arg0, %c0_i32 : i32, i32
  }
}

</mosaic_0001>

<bundles_post_ra>
// kernel: weighted_bce_loss.1
= control target key start
LH: loop header
LB: loop body
LE: loop exit
PB: predicated region body
PF: predicated region fallthrough
CT: control target
= control target key end

     0   :  { %v140_v26 = vmov 1.0   ;;  %s171_s0 = inlined_call_operand.vmem [shape: f32[16,128], index: 0, kind: input, shape index: {}]   ;;  %s172_s1 = inlined_call_operand.vmem [shape: f32[16,128], index: 1, kind: input, shape index: {}]   ;;  %s173_s2 = inlined_call_operand.vmem [shape: f32[8,128], index: 2, kind: output, shape index: {}]  }
   0x1   :  { %v61_v0 = vld [vmem:[%s171_s0] sm:$0xff]  ;;  %v62_v1 = vld [vmem:[%s171_s0 + $0x8] sm:$0xff] }
   0x2   :  { %v71_v2 = vand.u32 2147483647, %v61_v0  ;;  %v72_v3 = vand.u32 2147483647, %v62_v1  ;;  %v63_v13 = vld [vmem:[%s172_s1] sm:$0xff]  ;;  %v64_v15 = vld [vmem:[%s172_s1 + $0x8] sm:$0xff] }
   0x3   :  { %v65_v16 = vmax.f32 %v61_v0, 0.0  ;;  %v66_v17 = vmax.f32 %v62_v1, 0.0  ;;  %v67_v18 = vmul.f32 %v63_v13, %v61_v0  ;;  %vm99_vm0 = vcmp.eq.f32.partialorder %v63_v13, 1.0 }
   0x4   :  { %v73_v4 = vsub.f32 0.0, %v71_v2  ;;  %v74_v5 = vsub.f32 0.0, %v72_v3  ;;  %vm103_vm1 = vcmp.eq.f32.partialorder %v63_v13, 0.0  ;;  %v68_v22 = vmul.f32 %v64_v15, %v62_v1 }
   0x5   :  { %vm100_vm2 = vcmp.eq.f32.partialorder %v64_v15, 1.0  ;;  %vm104_vm3 = vcmp.eq.f32.partialorder %v64_v15, 0.0  ;;  %v69_v24 = vsub.f32 %v65_v16, %v67_v18  ;;  %v101_v27 = vsel %vm99_vm0, 2.0, %v140_v26 }
   0x6   :  { %v75_v6 = vmul.f32 1.442695, %v73_v4  ;;  %v77_v7 = vmul.f32 1.442695, %v74_v5  ;;  %v105_v28 = vsel %vm103_vm1, 0.5, %v140_v26  ;;  %v102_v31 = vsel %vm100_vm2, 2.0, %v140_v26 }
   0x7   :  { %v106_v32 = vsel %vm104_vm3, 0.5, %v140_v26  ;;  %v70_v34 = vsub.f32 %v66_v17, %v68_v22  ;;  %v107_v37 = vadd.f32 %v105_v28, %v101_v27 }
   0x8   :  { %132 = vpow2.f32 %v75_v6  ;;  %v108_v39 = vadd.f32 %v106_v32, %v102_v31 }
   0x9   :  { %134 = vpow2.f32 %v77_v7 }
  0x15   :  { %v133_v8 = vpop.eup %132 }
  0x16   :  { %v135_v9 = vpop.eup %134  ;;  %v79_v10 = vadd.f32 1.0, %v133_v8  ;;  %v82_v12 = vmul.f32 -0.5, %v133_v8  ;;  %v85_v20 = vand.u32 2147483647, %v133_v8 }
  0x17   :  { %v88_v11 = vadd.f32 1.0, %v135_v9  ;;  %v91_v14 = vmul.f32 -0.5, %v135_v9  ;;  %v94_v23 = vand.u32 2147483647, %v135_v9 }
  0x18   :  { %136 = vlog2.f32 %v79_v10  ;;  %v83_v19 = vadd.f32 1.0, %v82_v12  ;;  %vm86_vm4 = vcmp.lt.f32.partialorder %v85_v20, 0.0004427343 }
  0x19   :  { %138 = vlog2.f32 %v88_v11  ;;  %v92_v21 = vadd.f32 1.0, %v91_v14  ;;  %vm95_vm5 = vcmp.lt.f32.partialorder %v94_v23, 0.0004427343 }
  0x1a   :  { %v84_v25 = vmul.f32 %v133_v8, %v83_v19 }
  0x1b   :  { %v93_v30 = vmul.f32 %v135_v9, %v92_v21 }
  0x25   :  { %v137_v29 = vpop.eup %136 }
  0x26   :  { %v139_v33 = vpop.eup %138  ;;  %v81_v35 = vmul.f32 0.6931472, %v137_v29 }
  0x27   :  { %v90_v36 = vmul.f32 0.6931472, %v139_v33 }
  0x28   :  { %v87_v38 = vsel %vm86_vm4, %v84_v25, %v81_v35 }
  0x29   :  { %v96_v40 = vsel %vm95_vm5, %v93_v30, %v90_v36  ;;  %v97_v41 = vadd.f32 %v87_v38, %v69_v24 }
  0x2a   :  { %v98_v42 = vadd.f32 %v96_v40, %v70_v34 }
  0x2b   :  { %v109_v43 = vmul.f32 %v107_v37, %v97_v41 }
  0x2c   :  { %v110_v44 = vmul.f32 %v108_v39, %v98_v42 }
  0x2e   :  { %v111_v45 = vadd.f32 %v110_v44, %v109_v43 }
  0x30   :  { %113 = vst [vmem:[%s173_s2] sm:$0xff] %v111_v45 }

</bundles_post_ra>
